<compile_context>
chip_gen: v5e
topology: v5e:2x2
jax: 0.10.0
libtpu: 0.0.40
codegen_flags: <defaults>
</compile_context>

<pallas_src>
import jax
import jax.numpy as jnp
from jax.experimental import pallas as pl
from jax.experimental.pallas import tpu as pltpu

_LANE = 128  # TPU vreg lane width


def _round_up(x, m):
    return ((x + m - 1) // m) * m


def _tpu_vmem_capacity_bytes():
    """Physical per-core VMEM (64 MiB v7x, 128 MiB v5e/v6e); conservative fallback."""
    try:
        return int(pltpu.get_tpu_info().vmem_capacity_bytes)
    except Exception:
        return 64 << 20


def valuenet_kernel(x_ref, w1t_ref, b1_ref, w2_ref, b2_ref, o_ref):
    """One batch tile of relu(x @ W1 + b1) @ W2 + b2 in the transposed layout.

    x_ref  : (S, TB)  bf16, batch on the lane axis (pipelined over the grid)
    w1t_ref: (H, S)   bf16, W1 transposed, VMEM-resident across all grid steps
    b1_ref : (H, 1)   f32, resident
    w2_ref : (H, 1)   f32, resident
    b2_ref : (1, 1)   f32, SMEM scalar
    o_ref  : (1, TB)  f32, lane-dense output tile
    """
    # fc1 on the MXU: (H,S) @ (S,TB) -> (H,TB) with f32 accumulation.
    h = jnp.dot(w1t_ref[...], x_ref[...], preferred_element_type=jnp.float32)
    # Bias + ReLU on the VPU, in f32 (v5e-safe).
    h = jnp.maximum(h + b1_ref[...], 0.0)
    # fc2 without driving the MXU with a single output row:
    # VPU elementwise multiply + sublane (XLU) reduce over H.
    v = jnp.sum(h * w2_ref[...], axis=0, keepdims=True)        # (1, TB)
    o_ref[...] = v + b2_ref[0, 0]


def value_net_forward(x, w1, b1, w2, b2):
    """ValueNet forward.  x: (B,S); w1: (S,H); b1: (1,H); w2: (H,1); b2: (1,1) -> (B,1)."""
    x = jnp.asarray(x, jnp.float32)
    B, S = x.shape
    H = w1.shape[1]

    # ---- generation-aware batch tile: biggest lane multiple that fits VMEM ----
    vmem_cap = _tpu_vmem_capacity_bytes()
    vmem_limit = max(32 << 20, min(int(vmem_cap * 0.75), 96 << 20))  # headroom under physical cap
    budget = vmem_limit - (8 << 20)                                  # margin for compiler scratch

    weight_bytes = 2 * H * S + 4 * H + 4 * H + 4            # W1^T(bf16) + b1 + w2 (f32) + b2
    lane_bytes = (2 * 2 * S) + (4 * H) + (2 * 4)             # x(db,bf16) + h(f32) + out(db,f32)
    tb_cap = max(_LANE, ((budget - weight_bytes) // lane_bytes) // _LANE * _LANE)

    b_pad = _round_up(B, _LANE)
    if b_pad <= tb_cap:
        # Prefer >= 2 grid steps when the batch spans more than one lane group,
        # so v7x's two TensorCores both get work under "parallel" semantics.
        steps = 2 if b_pad >= 2 * _LANE else 1
    else:
        steps = max(2, -(-b_pad // tb_cap))
    tb = _round_up(-(-b_pad // steps), _LANE)
    b_pad = steps * tb

    # ---- host-side layout plumbing: single cast -> transpose -> tail pad ----
    x_t = jnp.pad(x.astype(jnp.bfloat16).T, ((0, 0), (0, b_pad - B)))   # (S, B_pad) bf16
    w1_t = jnp.asarray(w1, jnp.float32).T.astype(jnp.bfloat16)          # (H, S)     bf16
    b1_c = jnp.asarray(b1, jnp.float32).reshape(H, 1)                   # (H, 1)     f32
    w2_c = jnp.asarray(w2, jnp.float32).reshape(H, 1)                   # (H, 1)     f32
    b2_c = jnp.asarray(b2, jnp.float32).reshape(1, 1)                   # (1, 1) -> SMEM

    flops = 2 * B * H * (S + 1)
    bytes_accessed = 2 * S * b_pad + 2 * H * S + 4 * (2 * H + 1) + 4 * b_pad

    out_t = pl.pallas_call(
        valuenet_kernel,
        out_shape=jax.ShapeDtypeStruct((1, b_pad), jnp.float32),
        grid=(steps,),
        in_specs=[
            pl.BlockSpec((S, tb), lambda i: (0, i)),              # x tile (pipelined)
            pl.BlockSpec((H, S), lambda i: (0, 0)),               # W1^T resident
            pl.BlockSpec((H, 1), lambda i: (0, 0)),               # b1 resident
            pl.BlockSpec((H, 1), lambda i: (0, 0)),               # w2 resident
            pl.BlockSpec(memory_space=pltpu.MemorySpace.SMEM),    # b2 scalar (no VMEM DMA)
        ],
        out_specs=pl.BlockSpec((1, tb), lambda i: (0, i)),        # lane-dense stores
        compiler_params=pltpu.CompilerParams(
            dimension_semantics=("parallel",),                    # batch tiles shard on v7x's 2 TCs
            vmem_limit_bytes=int(vmem_limit)),
        cost_estimate=pl.CostEstimate(
            flops=flops, transcendentals=0, bytes_accessed=bytes_accessed),
    )(x_t, w1_t, b1_c, w2_c, b2_c)

    return out_t[:, :B].T                                         # back to (B, 1)


def init_params(key, state_size, hidden_dim):
    """Deterministic init mirroring PyTorch nn.Linear default (uniform +-1/sqrt(fan_in))."""
    k1, k2, k3, k4 = jax.random.split(key, 4)
    bound1 = 1.0 / jnp.sqrt(state_size)
    bound2 = 1.0 / jnp.sqrt(hidden_dim)
    w1 = jax.random.uniform(k1, (state_size, hidden_dim), jnp.float32, -bound1, bound1)
    b1 = jax.random.uniform(k2, (1, hidden_dim), jnp.float32, -bound1, bound1)
    w2 = jax.random.uniform(k3, (hidden_dim, 1), jnp.float32, -bound2, bound2)
    b2 = jax.random.uniform(k4, (1, 1), jnp.float32, -bound2, bound2)
    return w1, b1, w2, b2


if __name__ == "__main__":
    key = jax.random.PRNGKey(0)
    k_x, k_p = jax.random.split(key)

    batch, state_size, hidden_dim = 8, 4, 32
    x = jax.random.normal(k_x, (batch, state_size), jnp.float32)
    w1, b1, w2, b2 = init_params(k_p, state_size, hidden_dim)

    out = jax.block_until_ready(value_net_forward(x, w1, b1, w2, b2))

    # Pure-JAX reference check (PyTorch semantics: relu(x @ W1 + b1) @ W2 + b2).
    # Tolerance loosened for the bf16 input / f32-accumulate matmul path.
    ref = jnp.maximum(x @ w1 + b1, 0.0) @ w2 + b2
    assert out.shape == (batch, 1)
    assert jnp.allclose(out, ref, atol=5e-2, rtol=5e-2)

    print("KERNEL_OK")
</pallas_src>

<mosaic_0001>
module attributes {stable_mosaic.version = 11 : i64} {
  func.func @valuenet_kernel(%arg0: i32, %arg1: memref<4x128xbf16, #tpu.memory_space<vmem>>, %arg2: memref<32x4xbf16, #tpu.memory_space<vmem>>, %arg3: memref<32x1xf32, #tpu.memory_space<vmem>>, %arg4: memref<32x1xf32, #tpu.memory_space<vmem>>, %arg5: memref<1x1xf32, #tpu.memory_space<smem>>, %arg6: memref<1x128xf32, #tpu.memory_space<vmem>>) attributes {dimension_semantics = [#tpu.dimension_semantics<parallel>], iteration_bounds = array<i64: 1>, scalar_prefetch = 0 : i64, scratch_operands = 0 : i64, tpu.core_type = #tpu.core_type<tc>, window_params = [{transform_indices = @transform_0, window_bounds = array<i64: 4, 128>}, {pipeline_mode = #tpu.pipeline_mode<synchronous>, transform_indices = @transform_1, window_bounds = array<i64: 32, 4>}, {pipeline_mode = #tpu.pipeline_mode<synchronous>, transform_indices = @transform_2, window_bounds = array<i64: 32, 1>}, {pipeline_mode = #tpu.pipeline_mode<synchronous>, transform_indices = @transform_3, window_bounds = array<i64: 32, 1>}, {transform_indices = @transform_4, window_bounds = array<i64: 1, 1>}, {transform_indices = @transform_5, window_bounds = array<i64: 1, 128>}]} {
    %c0 = arith.constant 0 : index
    %c0_0 = arith.constant 0 : index
    %0 = vector.load %arg2[%c0, %c0_0] : memref<32x4xbf16, #tpu.memory_space<vmem>>, vector<32x4xbf16>
    %c0_1 = arith.constant 0 : index
    %c0_2 = arith.constant 0 : index
    %1 = vector.load %arg1[%c0_1, %c0_2] : memref<4x128xbf16, #tpu.memory_space<vmem>>, vector<4x128xbf16>
    %cst = arith.constant dense<0.000000e+00> : vector<32x128xf32>
    %2 = tpu.matmul %0, %1, %cst {dimension_numbers = #tpu.dot_dimension_numbers<[1], [0], [0], [1], [0, 0, 1, 1], [], []>} : vector<32x4xbf16>, vector<4x128xbf16>, vector<32x128xf32> -> vector<32x128xf32>
    %c0_3 = arith.constant 0 : index
    %c0_4 = arith.constant 0 : index
    %3 = vector.load %arg3[%c0_3, %c0_4] : memref<32x1xf32, #tpu.memory_space<vmem>>, vector<32x1xf32>
    %4 = vector.broadcast %3 : vector<32x1xf32> to vector<32x128xf32>
    %5 = arith.addf %2, %4 : vector<32x128xf32>
    %cst_5 = arith.constant 0.000000e+00 : f32
    %6 = vector.broadcast %cst_5 : f32 to vector<32x128xf32>
    %7 = arith.maximumf %5, %6 : vector<32x128xf32>
    %c0_6 = arith.constant 0 : index
    %c0_7 = arith.constant 0 : index
    %8 = vector.load %arg4[%c0_6, %c0_7] : memref<32x1xf32, #tpu.memory_space<vmem>>, vector<32x1xf32>
    %9 = vector.broadcast %8 : vector<32x1xf32> to vector<32x128xf32>
    %10 = arith.mulf %7, %9 : vector<32x128xf32>
    %cst_8 = arith.constant dense<0.000000e+00> : vector<128xf32>
    %11 = vector.multi_reduction <add>, %10, %cst_8 [0] : vector<32x128xf32> to vector<128xf32>
    %12 = vector.shape_cast %11 : vector<128xf32> to vector<1x128xf32>
    %c0_9 = arith.constant 0 : index
    %c0_10 = arith.constant 0 : index
    %13 = memref.load %arg5[%c0_9, %c0_10] : memref<1x1xf32, #tpu.memory_space<smem>>
    %14 = vector.broadcast %13 : f32 to vector<1x128xf32>
    %15 = arith.addf %12, %14 : vector<1x128xf32>
    %c0_11 = arith.constant 0 : index
    %c0_12 = arith.constant 0 : index
    %16 = vector.load %arg6[%c0_11, %c0_12] : memref<1x128xf32, #tpu.memory_space<vmem>>, vector<1x128xf32>
    tpu.vector_store %arg6[%c0_11, %c0_12], %15 {strides = array<i32>} : memref<1x128xf32, #tpu.memory_space<vmem>>, vector<1x128xf32>,
    return
  }
  func.func @transform_0(%arg0: i32) -> (i32, i32) {
    %c0_i32 = arith.constant 0 : i32
    %c0_i32_0 = arith.constant 0 : i32
    return %c0_i32, %arg0 : i32, i32
  }
  func.func @transform_1(%arg0: i32) -> (i32, i32) {
    %c0_i32 = arith.constant 0 : i32
    %c0_i32_0 = arith.constant 0 : i32
    %c0_i32_1 = arith.constant 0 : i32
    return %c0_i32, %c0_i32_0 : i32, i32
  }
  func.func @transform_2(%arg0: i32) -> (i32, i32) {
    %c0_i32 = arith.constant 0 : i32
    %c0_i32_0 = arith.constant 0 : i32
    %c0_i32_1 = arith.constant 0 : i32
    return %c0_i32, %c0_i32_0 : i32, i32
  }
  func.func @transform_3(%arg0: i32) -> (i32, i32) {
    %c0_i32 = arith.constant 0 : i32
    %c0_i32_0 = arith.constant 0 : i32
    %c0_i32_1 = arith.constant 0 : i32
    return %c0_i32, %c0_i32_0 : i32, i32
  }
  func.func @transform_4(%arg0: i32) -> (i32, i32) {
    %c0_i32 = arith.constant 0 : i32
    %c0_i32_0 = arith.constant 0 : i32
    %c0_i32_1 = arith.constant 0 : i32
    return %c0_i32, %c0_i32_0 : i32, i32
  }
  func.func @transform_5(%arg0: i32) -> (i32, i32) {
    %c0_i32 = arith.constant 0 : i32
    %c0_i32_0 = arith.constant 0 : i32
    return %c0_i32, %arg0 : i32, i32
  }
}

</mosaic_0001>

<bundles_post_ra>
// kernel: tpu_custom_call.1
= control target key start
LH: loop header
LB: loop body
LE: loop exit
PB: predicated region body
PF: predicated region fallthrough
CT: control target
= control target key end

     0   :  { %vm69_vm0 = vcmask 1041408   ;;  %v197_v3 = vmov 0   ;;  %vm62_vm1 = vcmask 31744   ;;  %s268_s0 = inlined_call_operand.vmem [shape: bf16[4,128], index: 0, kind: input, shape index: {}]   ;;  %s269_s1 = inlined_call_operand.vmem [shape: bf16[32,4], index: 1, kind: input, shape index: {}]   ;;  %s270_s2 = inlined_call_operand.vmem [shape: f32[32,1], index: 2, kind: input, shape index: {}]   ;;  %s271_s3 = inlined_call_operand.vmem [shape: f32[32,1], index: 3, kind: input, shape index: {}]   ;;  %s272_s4 = inlined_call_operand.<no memory space> [shape: f32[1,1], index: 4, kind: input, shape index: {}]   ;;  %s273_s5 = inlined_call_operand.hbm [shape: f32[1,128], index: 5, kind: output, shape index: {}]  }
   0x1   :  { %v30_v0 = vld [vmem:[%s270_s2 + $0x10] sm:$0xff]  ;;  %v28_v1 = vld [vmem:[%s270_s2] sm:$0xff]  ;;  %169 = vset.pattern.permute.xlu1 %v197_v3  ;;  %168 = vset.pattern.permute.xlu0 %v197_v3  ;;  %v164_v6 = vld [vmem:[%s269_s1 + $0x8] sm:$0xff] }
   0x2   :  { %v27_v2 = vld [vmem:[%s268_s0] sm:$0x3]  ;;  %44 = vperm.xlu1 %169, %v30_v0   ;;  %34 = vperm.xlu0 %168, %v28_v1  }
   0x3   :  { %v71_v4 = vsel %vm69_vm0, %v27_v2, 0  ;;  %v163_v5 = vld [vmem:[%s269_s1] sm:$0xff] }
   0x4   :  { %80 = vmatpush.bf16.msra.mxu0 %v71_v4  ;;  %165 = vmatpush.bf16.msra.mxu1 %v71_v4  ;;  %v96_v7 = vld [vmem:[%s271_s3] sm:$0xff] }
   0x5   :  { %11 = vsyncpa [#allocation4], 0  ;;  %170 = vset.pattern.permute.xlu2 %v197_v3  ;;  %v31_v8 = vld [vmem:[%s270_s2 + $0x18] sm:$0xff]  ;;  %v29_v9 = vld [vmem:[%s270_s2 + $0x8] sm:$0xff]  ;;  %v134_v45 = vstv %s272_s4  ;;  %s198_s13 = smov [#allocation3]   ;;  %s144_s17 = sshll.u32 %s273_s5, 4  ;;  %s145_s17 = int_to_ptr.hbm [resolvable:$true] %s144_s17 }
   0x6   :  { %102 = vperm.xlu2 %170, %v96_v7   ;;  %v97_v10 = vld [vmem:[%s271_s3 + $0x8] sm:$0xff]  ;;  %v99_v11 = vld [vmem:[%s271_s3 + $0x18] sm:$0xff]  ;;  %v98_v12 = vld [vmem:[%s271_s3 + $0x10] sm:$0xff]  ;;  %s142_s14 = sshll.u32 %s198_s13, 4  ;;  %s143_s14 = int_to_ptr.vmem [resolvable:$true] %s142_s14 }
   0x7   :  { %161 = vmatmul.msk.bf16.vlgmr.msra.gmra.mxu0 %vm62_vm1, %v163_v5  ;;  %162 = vmatmul.msk.bf16.vlgmr.msra.gmra.mxu1 %vm62_vm1, %v164_v6 }
   0xa   :  { %49 = vperm.xlu1 %169, %v31_v8   ;;  %39 = vperm.xlu0 %168, %v29_v9  }
   0xe   :  { %107 = vperm.xlu2 %170, %v97_v10  }
  0x12   :  { %117 = vperm.xlu1 %169, %v99_v11   ;;  %112 = vperm.xlu0 %168, %v98_v12  }
  0x60   :  { %v103_v17 = vpop.permute.xlu2 %102 }
  0x68   :  { %v108_v29 = vpop.permute.xlu2 %107 }
  0x74   :  { %v35_v13 = vpop.permute.xlu0 %34  ;;  %v45_v14 = vpop.permute.xlu1 %44 }
  0x7c   :  { %v40_v18 = vpop.permute.xlu0 %39  ;;  %v50_v20 = vpop.permute.xlu1 %49 }
  0x84   :  { %v82_v15 = vpop.f32.mrf.mxu0  ;;  %v87_v16 = vpop.f32.mrf.mxu1 }
  0x85   :  { %v83_v19 = vadd.f32 %v82_v15, %v35_v13  ;;  %v88_v21 = vadd.f32 %v87_v16, %v45_v14  ;;  %v113_v33 = vpop.permute.xlu0 %112  ;;  %v118_v36 = vpop.permute.xlu1 %117 }
  0x87   :  { %v92_v24 = vmax.f32 %v83_v19, 0.0  ;;  %v94_v27 = vmax.f32 %v88_v21, 0.0 }
  0x89   :  { %v120_v30 = vmul.f32 %v103_v17, %v92_v24  ;;  %v122_v34 = vmul.f32 %v113_v33, %v94_v27 }
  0x8c   :  { %v84_v22 = vpop.f32.mrf.mxu0  ;;  %v89_v23 = vpop.f32.mrf.mxu1 }
  0x8d   :  { %v85_v25 = vadd.f32 %v84_v22, %v40_v18  ;;  %v90_v26 = vadd.f32 %v89_v23, %v50_v20 }
  0x8f   :  { %v93_v28 = vmax.f32 %v85_v25, 0.0  ;;  %v95_v32 = vmax.f32 %v90_v26, 0.0 }
  0x91   :  { %v121_v31 = vmul.f32 %v108_v29, %v93_v28  ;;  %v123_v37 = vmul.f32 %v118_v36, %v95_v32 }
  0x93   :  { %v124_v35 = vadd.f32 %v121_v31, %v120_v30 }
  0x95   :  { %v125_v38 = vadd.f32 %v124_v35, %v122_v34 }
  0x97   :  { %v126_v39 = vadd.f32 %v125_v38, %v123_v37 }
  0x99   :  { %v127_v40 = vrot.slane %v126_v39, 4 }
  0x9b   :  { %v128_v41 = vadd.f32 %v127_v40, %v126_v39 }
  0x9d   :  { %v129_v42 = vrot.slane %v128_v41, 2 }
  0x9f   :  { %v130_v43 = vadd.f32 %v129_v42, %v128_v41 }
  0xa1   :  { %v131_v44 = vrot.slane %v130_v43, 1 }
  0xa3   :  { %v132_v46 = vadd.f32 %v131_v44, %v130_v43 }
  0xa5   :  { %v135_v47 = vadd.f32 %v134_v45, %v132_v46 }
  0xa7   :  { %136 = vst [vmem:[#allocation3] sm:$0x1] %v135_v47 }
  0xa8   :  { %147 = dma.vmem_to_hbm [thread:$0]  %s143_s14, 16, %s145_s17, [#allocation4]  }
  0xa9   :  { %195 = dma.done.wait [#allocation4], 16  }
  0xaa   :  { %196 = vsyncadd [#allocation4], 4294967280 }
  0xab   :  { %152 = vsyncpa [#allocation4], 1 }

</bundles_post_ra>
